<compile_context>
chip_gen: v5e
topology: v5e:2x2
jax: 0.10.0
libtpu: 0.0.40
codegen_flags: <defaults>
</compile_context>

<pallas_src>
import jax
import jax.numpy as jnp
from jax.experimental import pallas as pl
from jax.experimental.pallas import tpu as pltpu


def _identity_kernel(x_ref, o_ref):
    # Straight VMEM tile copy; output HBM buffer aliases the input buffer.
    o_ref[...] = x_ref[...]


def _dummy_module_forward(x: jax.Array) -> jax.Array:
    """Pallas equivalent of DummyModule.forward: returns inputs unchanged."""
    return pl.pallas_call(
        _identity_kernel,
        out_shape=jax.ShapeDtypeStruct(x.shape, x.dtype),
        # No grid: the whole (tiny) array is a single VMEM-resident block.
        in_specs=[pl.BlockSpec(memory_space=pltpu.MemorySpace.VMEM)],
        out_specs=pl.BlockSpec(memory_space=pltpu.MemorySpace.VMEM),
        # Output buffer aliases input buffer -> no new HBM allocation.
        input_output_aliases={0: 0},
    )(x)


# Donate the input so the aliasing actually takes effect (no defensive copy).
dummy_module_forward = jax.jit(_dummy_module_forward, donate_argnums=(0,))


if __name__ == "__main__":
    key = jax.random.PRNGKey(0)
    shape, dtype = (2, 4, 16, 16), jnp.float32

    # x is donated to the kernel; regenerate an identical reference copy from
    # the same key for the correctness check.
    x = jax.random.normal(key, shape, dtype=dtype)
    x_check = jax.random.normal(key, shape, dtype=dtype)

    y = dummy_module_forward(x)
    y = jax.block_until_ready(y)

    assert y.shape == x_check.shape and y.dtype == x_check.dtype
    assert bool(jnp.array_equal(y, x_check))
    print("KERNEL_OK")
</pallas_src>

<mosaic_0001>
module attributes {stable_mosaic.version = 11 : i64} {
  func.func @_identity_kernel(%arg0: memref<2x4x16x16xf32, #tpu.memory_space<vmem>>, %arg1: memref<2x4x16x16xf32, #tpu.memory_space<vmem>>) attributes {dimension_semantics = [], scalar_prefetch = 0 : i64, scratch_operands = 0 : i64, tpu.core_type = #tpu.core_type<tc>} {
    %c0 = arith.constant 0 : index
    %c0_0 = arith.constant 0 : index
    %c0_1 = arith.constant 0 : index
    %c0_2 = arith.constant 0 : index
    %0 = vector.load %arg0[%c0, %c0_0, %c0_1, %c0_2] : memref<2x4x16x16xf32, #tpu.memory_space<vmem>>, vector<2x4x16x16xf32>
    %c0_3 = arith.constant 0 : index
    %c0_4 = arith.constant 0 : index
    %c0_5 = arith.constant 0 : index
    %c0_6 = arith.constant 0 : index
    %1 = vector.load %arg1[%c0_3, %c0_4, %c0_5, %c0_6] : memref<2x4x16x16xf32, #tpu.memory_space<vmem>>, vector<2x4x16x16xf32>
    tpu.vector_store %arg1[%c0_3, %c0_4, %c0_5, %c0_6], %0 {strides = array<i32>} : memref<2x4x16x16xf32, #tpu.memory_space<vmem>>, vector<2x4x16x16xf32>,
    return
  }
}

</mosaic_0001>

<bundles_post_ra>
// kernel: _dummy_module_forward.1
= control target key start
LH: loop header
LB: loop body
LE: loop exit
PB: predicated region body
PF: predicated region fallthrough
CT: control target
= control target key end

     0   :  { %6 = vsyncpa [#allocation3], 0  ;;  %s175_s0 = inlined_call_operand.hbm [shape: f32[2,4,16,16], index: 0, kind: input, shape index: {}, may-alias: {0,1}]   ;;  %s176_s1 = inlined_call_operand.hbm [shape: f32[2,4,16,16], index: 1, kind: output, shape index: {}, may-alias: {0,1}]  }
   0x1   :  { %7 = vsyncpa [#allocation4], 0  ;;  %s12_s8 = sshll.u32 %s175_s0, 4  ;;  %s133_s9 = smov [#allocation2]   ;;  %s13_s8 = int_to_ptr.hbm [resolvable:$true] %s12_s8 }
   0x2   :  { %s14_s10 = sshll.u32 %s133_s9, 4  ;;  %s134_s11 = smov 128   ;;  %s15_s10 = int_to_ptr.vmem [resolvable:$true] %s14_s10 }
   0x3   :  { %s135_s12 = smov 8  }
   0x4   :  { %20 = dma.hbm_to_vmem [thread:$0]  %s13_s8, 2048, %s15_s10, [#allocation3], %s134_s11, %s134_s11, %s135_s12  }
   0x5   :  { %129 = dma.done.wait [#allocation3], 2048  }
   0x6   :  { %130 = vsyncadd [#allocation3], 4294965248  ;;  %vm41_vm0 = vcmask 130048   ;;  %v25_v0 = vld [vmem:[#allocation2] sm:$0xff]  ;;  %v26_v1 = vld [vmem:[#allocation2 + $0x8] sm:$0xff]  ;;  %s136_s0 = smov [#allocation5]  }
   0x7   :  { %v27_v2 = vld [vmem:[#allocation2 + $0x10] sm:$0xff]  ;;  %42 = vst.msk [vmem:[#allocation5] sm:$0xff] %vm41_vm0, %v25_v0  ;;  %v28_v3 = vld [vmem:[#allocation2 + $0x18] sm:$0xff]  ;;  %v29_v4 = vld [vmem:[#allocation2 + $0x20] sm:$0xff]  ;;  %s62_s13 = sshll.u32 %s136_s0, 4  ;;  %s64_s16 = sshll.u32 %s176_s1, 4  ;;  %s63_s13 = int_to_ptr.vmem [resolvable:$true] %s62_s13  ;;  %s65_s16 = int_to_ptr.hbm [resolvable:$true] %s64_s16 }
   0x8   :  { %43 = vst.msk [vmem:[#allocation5 + $0x8] sm:$0xff] %vm41_vm0, %v26_v1  ;;  %v30_v5 = vld [vmem:[#allocation2 + $0x28] sm:$0xff]  ;;  %v31_v6 = vld [vmem:[#allocation2 + $0x30] sm:$0xff]  ;;  %v32_v7 = vld [vmem:[#allocation2 + $0x38] sm:$0xff] }
   0x9   :  { %44 = vst.msk [vmem:[#allocation5 + $0x10] sm:$0xff] %vm41_vm0, %v27_v2  ;;  %v33_v8 = vld [vmem:[#allocation2 + $0x40] sm:$0xff]  ;;  %v34_v9 = vld [vmem:[#allocation2 + $0x48] sm:$0xff]  ;;  %v35_v10 = vld [vmem:[#allocation2 + $0x50] sm:$0xff] }
   0xa   :  { %45 = vst.msk [vmem:[#allocation5 + $0x18] sm:$0xff] %vm41_vm0, %v28_v3  ;;  %v36_v11 = vld [vmem:[#allocation2 + $0x58] sm:$0xff]  ;;  %v37_v12 = vld [vmem:[#allocation2 + $0x60] sm:$0xff]  ;;  %v38_v13 = vld [vmem:[#allocation2 + $0x68] sm:$0xff] }
   0xb   :  { %46 = vst.msk [vmem:[#allocation5 + $0x20] sm:$0xff] %vm41_vm0, %v29_v4  ;;  %v39_v14 = vld [vmem:[#allocation2 + $0x70] sm:$0xff]  ;;  %v40_v15 = vld [vmem:[#allocation2 + $0x78] sm:$0xff] }
   0xc   :  { %47 = vst.msk [vmem:[#allocation5 + $0x28] sm:$0xff] %vm41_vm0, %v30_v5 }
   0xd   :  { %48 = vst.msk [vmem:[#allocation5 + $0x30] sm:$0xff] %vm41_vm0, %v31_v6 }
   0xe   :  { %49 = vst.msk [vmem:[#allocation5 + $0x38] sm:$0xff] %vm41_vm0, %v32_v7 }
   0xf   :  { %50 = vst.msk [vmem:[#allocation5 + $0x40] sm:$0xff] %vm41_vm0, %v33_v8 }
  0x10   :  { %51 = vst.msk [vmem:[#allocation5 + $0x48] sm:$0xff] %vm41_vm0, %v34_v9 }
  0x11   :  { %52 = vst.msk [vmem:[#allocation5 + $0x50] sm:$0xff] %vm41_vm0, %v35_v10 }
  0x12   :  { %53 = vst.msk [vmem:[#allocation5 + $0x58] sm:$0xff] %vm41_vm0, %v36_v11 }
  0x13   :  { %54 = vst.msk [vmem:[#allocation5 + $0x60] sm:$0xff] %vm41_vm0, %v37_v12 }
  0x14   :  { %55 = vst.msk [vmem:[#allocation5 + $0x68] sm:$0xff] %vm41_vm0, %v38_v13 }
  0x15   :  { %56 = vst.msk [vmem:[#allocation5 + $0x70] sm:$0xff] %vm41_vm0, %v39_v14 }
  0x16   :  { %57 = vst.msk [vmem:[#allocation5 + $0x78] sm:$0xff] %vm41_vm0, %v40_v15 }
  0x17   :  { %70 = dma.vmem_to_hbm [thread:$0]  %s63_s13, 2048, %s65_s16, [#allocation4], %s134_s11, %s134_s11, %s135_s12  }
  0x18   :  { %131 = dma.done.wait [#allocation4], 2048  }
  0x19   :  { %132 = vsyncadd [#allocation4], 4294965248 }
  0x1a   :  { %75 = vsyncpa [#allocation3], 1 }
  0x1b   :  { %76 = vsyncpa [#allocation4], 1 }

</bundles_post_ra>
